<compile_context>
chip_gen: v7x
topology: tpu7x:2x2x1
jax: 0.10.0
libtpu: 0.0.40
codegen_flags: <defaults>
</compile_context>

<pallas_src>
import functools

import numpy as np
import jax
import jax.numpy as jnp
from jax.experimental import pallas as pl
from jax.experimental.pallas import tpu as pltpu


# ----------------------------------------------------------------------------
# Pallas kernel
# ----------------------------------------------------------------------------
def _intra_ma_kernel(num_heads, head_dim, inv_scale, matmul_dtype, with_scores,
                     hef_ref, nf_ref, inc_ref, eohr_ref, nohr_ref,
                     wq_ref, wkv_ref,
                     ge_ref, be_ref, gn_ref, bn_ref,
                     wo_ref, bo_ref,
                     out_ref, *score_refs):
    f32 = jnp.float32
    md = matmul_dtype
    eps = 1e-5
    H, D = num_heads, head_dim
    HD = H * D
    E = hef_ref.shape[0]
    N = nf_ref.shape[0]

    def layernorm(x, g, b):
        mu = jnp.mean(x, axis=-1, keepdims=True)
        var = jnp.mean((x - mu) ** 2, axis=-1, keepdims=True)
        return (x - mu) * jax.lax.rsqrt(var + eps) * g + b

    hn = layernorm(hef_ref[...].astype(f32), ge_ref[...], be_ref[...])   # [E, Din]
    nfn = layernorm(nf_ref[...].astype(f32), gn_ref[...], bn_ref[...])   # [N, Din]

    # Type-combined projections: one lane-dense contraction each instead of
    # per-type masked matmuls accumulated with VPU adds.
    hn_t = jnp.concatenate([hn] * 4, axis=-1) * eohr_ref[...]            # [E, 4*Din]
    nfn_t = jnp.concatenate([nfn] * 2, axis=-1) * nohr_ref[...]          # [N, 2*Din]

    # Q projection; fold 1/scale into q once (instead of dividing every
    # [H,E,N] score tile).
    q = jnp.dot(hn_t.astype(md), wq_ref[...],
                preferred_element_type=f32) * inv_scale                  # [E, H*D]

    # K and V share the same input -> single fused, wider (lane-denser) matmul.
    kv = jnp.dot(nfn_t.astype(md), wkv_ref[...],
                 preferred_element_type=f32)                             # [N, 2*H*D]
    k = kv[:, :HD]
    v = kv[:, HD:]

    q3 = q.reshape(E, H, D)
    k3 = k.reshape(N, H, D)
    v3 = v.reshape(N, H, D)

    # All heads' scores in one batched MXU op.
    s = jnp.einsum('ehd,nhd->hen', q3.astype(md), k3.astype(md),
                   preferred_element_type=f32)                           # [H, E, N]

    # Incidence mask computed exactly once (hoisted out of any per-head work).
    mask = (inc_ref[...] == 0.0)[None, :, :]                             # [1, E, N]
    s = jnp.where(mask, jnp.float32(-jnp.inf), s)
    # TODO(synk): an edge with zero incident nodes yields a NaN softmax row,
    # matching the PyTorch reference's softmax-of-all--inf behaviour.
    if with_scores:
        score_refs[0][...] = s          # single contiguous [H,E,N] store

    m = jnp.max(s, axis=-1, keepdims=True)
    p = jnp.exp(s - m)
    denom = jnp.sum(p, axis=-1, keepdims=True)
    w = p * pl.reciprocal(denom, approx=True)    # EUP reciprocal, not VPU divide
    # TODO(synk): nn.Dropout(p) on the attention weights is identity (eval mode).

    # All heads' outputs in one batched MXU op, flattened once to [E, H*D].
    o = jnp.einsum('hen,nhd->ehd', w.astype(md), v3.astype(md),
                   preferred_element_type=f32)                           # [E, H, D]
    o = o.reshape(E, HD)
    act = o * jax.nn.sigmoid(o)                                          # SiLU

    # Fused to_out: cat([hn, act]) @ W_o + b_o  -> one K=Din+H*D contraction.
    cat = jnp.concatenate([hn, act], axis=-1)                            # [E, Din+H*D]
    final = jnp.dot(cat.astype(md), wo_ref[...],
                    preferred_element_type=f32) + bo_ref[...]
    out_ref[...] = final.astype(out_ref.dtype)


# ----------------------------------------------------------------------------
# JAX wrapper (glue: type masks, incidence transpose, weight fusion)
# ----------------------------------------------------------------------------
def intra_ma_forward(params, hyperedge_features, node_features,
                     incidence_matrix, node_types, hyperedge_types,
                     *, num_heads, embedding_dim,
                     matmul_dtype=jnp.float32, with_scores=True):
    E, Din = hyperedge_features.shape
    N = node_features.shape[0]
    HD = num_heads * embedding_dim

    # hyperedge type values live in {0, 2, 3, 4} -> indices {0, 1, 2, 3}
    type_to_idx = jnp.array([0, 0, 1, 2, 3], dtype=jnp.int32)
    e_idx = type_to_idx[hyperedge_types]
    eoh = jax.nn.one_hot(e_idx, 4, dtype=jnp.float32)             # [E, 4]
    noh = jax.nn.one_hot(node_types, 2, dtype=jnp.float32)        # [N, 2]
    # Repeat each type-mask column Din times so the kernel forms the
    # type-blocked activations with a single elementwise multiply.
    eoh_rep = jnp.repeat(eoh, Din, axis=1)                        # [E, 4*Din]
    noh_rep = jnp.repeat(noh, Din, axis=1)                        # [N, 2*Din]
    inc_t = incidence_matrix.T.astype(jnp.float32)                # [E, N]

    md = matmul_dtype
    wq = params["wq"].reshape(4 * Din, HD).astype(md)             # [4*Din, H*D]
    wkv = jnp.concatenate(                                        # [2*Din, 2*H*D]
        [params["wk"].reshape(2 * Din, HD),
         params["wv"].reshape(2 * Din, HD)], axis=1).astype(md)
    wo = jnp.concatenate(                                         # [Din+H*D, Din]
        [params["wo_h"], params["wo_a"]], axis=0).astype(md)

    kernel = functools.partial(
        _intra_ma_kernel, num_heads, embedding_dim,
        1.0 / float(embedding_dim) ** 0.5, md, with_scores)

    inputs = (hyperedge_features.astype(jnp.float32),
              node_features.astype(jnp.float32),
              inc_t, eoh_rep, noh_rep,
              wq, wkv,
              params["gamma_e"], params["beta_e"],
              params["gamma_n"], params["beta_n"],
              wo, params["b_o"])

    vmem = pl.BlockSpec(memory_space=pltpu.MemorySpace.VMEM)
    out_shape = [jax.ShapeDtypeStruct((E, Din), jnp.float32)]
    if with_scores:
        out_shape.append(jax.ShapeDtypeStruct((num_heads, E, N), jnp.float32))

    # TODO(synk): at scaled E/N this should grow a grid over E (streaming N
    # flash-style) with "parallel" dimension_semantics so v7x's two TensorCores
    # and 64 MiB VMEM are respected; at these sizes one full-array VMEM
    # invocation is optimal on all generations.
    outs = pl.pallas_call(
        kernel,
        out_shape=tuple(out_shape),
        in_specs=[vmem] * len(inputs),
        out_specs=tuple([vmem] * len(out_shape)),
    )(*inputs)

    if with_scores:
        return outs
    return outs[0], None


# ----------------------------------------------------------------------------
# Deterministic parameter init (shapes follow the PyTorch __init__)
# ----------------------------------------------------------------------------
def init_params(key, input_dim, embedding_dim, num_heads):
    hd = embedding_dim * num_heads
    ks = jax.random.split(key, 5)

    def lin(k, fan_in, shape):
        bound = 1.0 / np.sqrt(fan_in)
        return jax.random.uniform(k, shape, jnp.float32, -bound, bound)

    wq = lin(ks[0], input_dim, (4, input_dim, hd))     # hyper_query_linears (types 0,2,3,4)
    wk = lin(ks[1], input_dim, (2, input_dim, hd))     # node_key_linears (types 0,1)
    wv = lin(ks[2], input_dim, (2, input_dim, hd))     # node_value_linears
    wo_t = lin(ks[3], hd + input_dim, (hd + input_dim, input_dim))   # to_out weight (transposed)
    b_o = lin(ks[4], hd + input_dim, (1, input_dim))                 # to_out bias

    return dict(
        wq=wq, wk=wk, wv=wv,
        wo_h=wo_t[:input_dim],    # acts on the (normed) hyperedge features
        wo_a=wo_t[input_dim:],    # acts on the SiLU'd attention output
        b_o=b_o,
        gamma_e=jnp.ones((1, input_dim), jnp.float32),
        beta_e=jnp.zeros((1, input_dim), jnp.float32),
        gamma_n=jnp.ones((1, input_dim), jnp.float32),
        beta_n=jnp.zeros((1, input_dim), jnp.float32),
    )


# ----------------------------------------------------------------------------
# Pure-JAX reference (mirrors the PyTorch forward)
# ----------------------------------------------------------------------------
def intra_ma_reference(params, hef, nf, inc, node_types, edge_types,
                       *, num_heads, embedding_dim):
    def ln(x, g, b):
        mu = x.mean(-1, keepdims=True)
        var = ((x - mu) ** 2).mean(-1, keepdims=True)
        return (x - mu) / jnp.sqrt(var + 1e-5) * g + b

    hn = ln(hef, params["gamma_e"], params["beta_e"])
    nfn = ln(nf, params["gamma_n"], params["beta_n"])

    type_to_idx = jnp.array([0, 0, 1, 2, 3], dtype=jnp.int32)
    qi = type_to_idx[edge_types]
    q = jnp.einsum("ei,eio->eo", hn, params["wq"][qi])
    k = jnp.einsum("ni,nio->no", nfn, params["wk"][node_types])
    v = jnp.einsum("ni,nio->no", nfn, params["wv"][node_types])

    E, N = hef.shape[0], nf.shape[0]
    H, D = num_heads, embedding_dim
    qh = q.reshape(E, H, D).transpose(1, 0, 2)
    kh = k.reshape(N, H, D).transpose(1, 0, 2)
    vh = v.reshape(N, H, D).transpose(1, 0, 2)

    scores = jnp.einsum("hid,hjd->hij", qh, kh) / (embedding_dim ** 0.5)
    mask = (inc.T == 0)[None]                      # [1, E, N]
    scores = jnp.where(mask, -jnp.inf, scores)
    weights = jax.nn.softmax(scores, axis=-1)
    out = jnp.einsum("hij,hjd->hid", weights, vh)
    out = out.transpose(1, 0, 2).reshape(E, H * D)
    act = out * jax.nn.sigmoid(out)
    final = hn @ params["wo_h"] + act @ params["wo_a"] + params["b_o"]
    return final, scores


# ----------------------------------------------------------------------------
if __name__ == "__main__":
    input_dim = 32
    embedding_dim = 8
    num_heads = 4
    num_edges = 8
    num_nodes = 16

    key = jax.random.PRNGKey(0)
    k_par, k_he, k_no, k_inc, k_nt, k_et = jax.random.split(key, 6)

    params = init_params(k_par, input_dim, embedding_dim, num_heads)

    hyperedge_features = jax.random.normal(k_he, (num_edges, input_dim), jnp.float32)
    node_features = jax.random.normal(k_no, (num_nodes, input_dim), jnp.float32)

    # incidence matrix is [num_nodes, num_edges]; ensure every edge has >=1 node
    inc = (jax.random.uniform(k_inc, (num_nodes, num_edges)) < 0.4).astype(jnp.float32)
    inc = inc.at[0, :].set(1.0)

    node_types = jax.random.randint(k_nt, (num_nodes,), 0, 2)              # {0, 1}
    hyperedge_types = jnp.array([0, 2, 3, 4], dtype=jnp.int32)[
        jax.random.randint(k_et, (num_edges,), 0, 4)]                      # {0, 2, 3, 4}

    final, scores = intra_ma_forward(
        params, hyperedge_features, node_features, inc,
        node_types, hyperedge_types,
        num_heads=num_heads, embedding_dim=embedding_dim)
    jax.block_until_ready((final, scores))

    ref_final, ref_scores = intra_ma_reference(
        params, hyperedge_features, node_features, inc,
        node_types, hyperedge_types,
        num_heads=num_heads, embedding_dim=embedding_dim)

    assert final.shape == (num_edges, input_dim)
    assert scores.shape == (num_heads, num_edges, num_nodes)
    np.testing.assert_allclose(np.asarray(final), np.asarray(ref_final),
                               rtol=1e-2, atol=1e-2)
    np.testing.assert_allclose(np.asarray(scores), np.asarray(ref_scores),
                               rtol=1e-2, atol=1e-2)

    print("KERNEL_OK")
</pallas_src>

<mosaic_0001>
module attributes {stable_mosaic.version = 11 : i64} {
  func.func @_intra_ma_kernel(%arg0: memref<8x32xf32, #tpu.memory_space<vmem>>, %arg1: memref<16x32xf32, #tpu.memory_space<vmem>>, %arg2: memref<8x16xf32, #tpu.memory_space<vmem>>, %arg3: memref<8x128xf32, #tpu.memory_space<vmem>>, %arg4: memref<16x64xf32, #tpu.memory_space<vmem>>, %arg5: memref<128x32xf32, #tpu.memory_space<vmem>>, %arg6: memref<64x64xf32, #tpu.memory_space<vmem>>, %arg7: memref<1x32xf32, #tpu.memory_space<vmem>>, %arg8: memref<1x32xf32, #tpu.memory_space<vmem>>, %arg9: memref<1x32xf32, #tpu.memory_space<vmem>>, %arg10: memref<1x32xf32, #tpu.memory_space<vmem>>, %arg11: memref<64x32xf32, #tpu.memory_space<vmem>>, %arg12: memref<1x32xf32, #tpu.memory_space<vmem>>, %arg13: memref<8x32xf32, #tpu.memory_space<vmem>>, %arg14: memref<4x8x16xf32, #tpu.memory_space<vmem>>) attributes {dimension_semantics = [], scalar_prefetch = 0 : i64, scratch_operands = 0 : i64, tpu.core_type = #tpu.core_type<tc>} {
    %c0 = arith.constant 0 : index
    %c0_0 = arith.constant 0 : index
    %0 = vector.load %arg0[%c0, %c0_0] : memref<8x32xf32, #tpu.memory_space<vmem>>, vector<8x32xf32>
    %c0_1 = arith.constant 0 : index
    %c0_2 = arith.constant 0 : index
    %1 = vector.load %arg7[%c0_1, %c0_2] : memref<1x32xf32, #tpu.memory_space<vmem>>, vector<1x32xf32>
    %c0_3 = arith.constant 0 : index
    %c0_4 = arith.constant 0 : index
    %2 = vector.load %arg8[%c0_3, %c0_4] : memref<1x32xf32, #tpu.memory_space<vmem>>, vector<1x32xf32>
    %cst = arith.constant dense<0.000000e+00> : vector<8xf32>
    %3 = vector.multi_reduction <add>, %0, %cst [1] : vector<8x32xf32> to vector<8xf32>
    %4 = vector.shape_cast %3 : vector<8xf32> to vector<8x1xf32>
    %cst_5 = arith.constant 3.200000e+01 : f32
    %5 = vector.broadcast %cst_5 : f32 to vector<8x1xf32>
    %6 = arith.divf %4, %5 : vector<8x1xf32>
    %7 = vector.broadcast %6 : vector<8x1xf32> to vector<8x32xf32>
    %8 = arith.subf %0, %7 : vector<8x32xf32>
    %9 = arith.mulf %8, %8 : vector<8x32xf32>
    %cst_6 = arith.constant dense<0.000000e+00> : vector<8xf32>
    %10 = vector.multi_reduction <add>, %9, %cst_6 [1] : vector<8x32xf32> to vector<8xf32>
    %11 = vector.shape_cast %10 : vector<8xf32> to vector<8x1xf32>
    %cst_7 = arith.constant 3.200000e+01 : f32
    %12 = vector.broadcast %cst_7 : f32 to vector<8x1xf32>
    %13 = arith.divf %11, %12 : vector<8x1xf32>
    %14 = vector.broadcast %6 : vector<8x1xf32> to vector<8x32xf32>
    %15 = arith.subf %0, %14 : vector<8x32xf32>
    %cst_8 = arith.constant 9.99999974E-6 : f32
    %16 = vector.broadcast %cst_8 : f32 to vector<8x1xf32>
    %17 = arith.addf %13, %16 : vector<8x1xf32>
    %18 = math.rsqrt %17 : vector<8x1xf32>
    %19 = vector.broadcast %18 : vector<8x1xf32> to vector<8x32xf32>
    %20 = arith.mulf %15, %19 : vector<8x32xf32>
    %21 = vector.broadcast %1 : vector<1x32xf32> to vector<8x32xf32>
    %22 = arith.mulf %20, %21 : vector<8x32xf32>
    %23 = vector.broadcast %2 : vector<1x32xf32> to vector<8x32xf32>
    %24 = arith.addf %22, %23 : vector<8x32xf32>
    %c0_9 = arith.constant 0 : index
    %c0_10 = arith.constant 0 : index
    %25 = vector.load %arg1[%c0_9, %c0_10] : memref<16x32xf32, #tpu.memory_space<vmem>>, vector<16x32xf32>
    %c0_11 = arith.constant 0 : index
    %c0_12 = arith.constant 0 : index
    %26 = vector.load %arg9[%c0_11, %c0_12] : memref<1x32xf32, #tpu.memory_space<vmem>>, vector<1x32xf32>
    %c0_13 = arith.constant 0 : index
    %c0_14 = arith.constant 0 : index
    %27 = vector.load %arg10[%c0_13, %c0_14] : memref<1x32xf32, #tpu.memory_space<vmem>>, vector<1x32xf32>
    %cst_15 = arith.constant dense<0.000000e+00> : vector<16xf32>
    %28 = vector.multi_reduction <add>, %25, %cst_15 [1] : vector<16x32xf32> to vector<16xf32>
    %29 = vector.shape_cast %28 : vector<16xf32> to vector<16x1xf32>
    %cst_16 = arith.constant 3.200000e+01 : f32
    %30 = vector.broadcast %cst_16 : f32 to vector<16x1xf32>
    %31 = arith.divf %29, %30 : vector<16x1xf32>
    %32 = vector.broadcast %31 : vector<16x1xf32> to vector<16x32xf32>
    %33 = arith.subf %25, %32 : vector<16x32xf32>
    %34 = arith.mulf %33, %33 : vector<16x32xf32>
    %cst_17 = arith.constant dense<0.000000e+00> : vector<16xf32>
    %35 = vector.multi_reduction <add>, %34, %cst_17 [1] : vector<16x32xf32> to vector<16xf32>
    %36 = vector.shape_cast %35 : vector<16xf32> to vector<16x1xf32>
    %cst_18 = arith.constant 3.200000e+01 : f32
    %37 = vector.broadcast %cst_18 : f32 to vector<16x1xf32>
    %38 = arith.divf %36, %37 : vector<16x1xf32>
    %39 = vector.broadcast %31 : vector<16x1xf32> to vector<16x32xf32>
    %40 = arith.subf %25, %39 : vector<16x32xf32>
    %cst_19 = arith.constant 9.99999974E-6 : f32
    %41 = vector.broadcast %cst_19 : f32 to vector<16x1xf32>
    %42 = arith.addf %38, %41 : vector<16x1xf32>
    %43 = math.rsqrt %42 : vector<16x1xf32>
    %44 = vector.broadcast %43 : vector<16x1xf32> to vector<16x32xf32>
    %45 = arith.mulf %40, %44 : vector<16x32xf32>
    %46 = vector.broadcast %26 : vector<1x32xf32> to vector<16x32xf32>
    %47 = arith.mulf %45, %46 : vector<16x32xf32>
    %48 = vector.broadcast %27 : vector<1x32xf32> to vector<16x32xf32>
    %49 = arith.addf %47, %48 : vector<16x32xf32>
    %50 = tpu.concatenate %24, %24, %24, %24 in 1 : vector<8x32xf32>, vector<8x32xf32>, vector<8x32xf32>, vector<8x32xf32> -> vector<8x128xf32>
    %c0_20 = arith.constant 0 : index
    %c0_21 = arith.constant 0 : index
    %51 = vector.load %arg3[%c0_20, %c0_21] : memref<8x128xf32, #tpu.memory_space<vmem>>, vector<8x128xf32>
    %52 = arith.mulf %50, %51 : vector<8x128xf32>
    %53 = tpu.concatenate %49, %49 in 1 : vector<16x32xf32>, vector<16x32xf32> -> vector<16x64xf32>
    %c0_22 = arith.constant 0 : index
    %c0_23 = arith.constant 0 : index
    %54 = vector.load %arg4[%c0_22, %c0_23] : memref<16x64xf32, #tpu.memory_space<vmem>>, vector<16x64xf32>
    %55 = arith.mulf %53, %54 : vector<16x64xf32>
    %c0_24 = arith.constant 0 : index
    %c0_25 = arith.constant 0 : index
    %56 = vector.load %arg5[%c0_24, %c0_25] : memref<128x32xf32, #tpu.memory_space<vmem>>, vector<128x32xf32>
    %cst_26 = arith.constant dense<0.000000e+00> : vector<8x32xf32>
    %57 = tpu.matmul %52, %56, %cst_26 {dimension_numbers = #tpu.dot_dimension_numbers<[1], [0], [0], [1], [0, 0, 1, 1], [], []>} : vector<8x128xf32>, vector<128x32xf32>, vector<8x32xf32> -> vector<8x32xf32>
    %cst_27 = arith.constant 0.353553385 : f32
    %58 = vector.broadcast %cst_27 : f32 to vector<8x32xf32>
    %59 = arith.mulf %57, %58 : vector<8x32xf32>
    %c0_28 = arith.constant 0 : index
    %c0_29 = arith.constant 0 : index
    %60 = vector.load %arg6[%c0_28, %c0_29] : memref<64x64xf32, #tpu.memory_space<vmem>>, vector<64x64xf32>
    %cst_30 = arith.constant dense<0.000000e+00> : vector<16x64xf32>
    %61 = tpu.matmul %55, %60, %cst_30 {dimension_numbers = #tpu.dot_dimension_numbers<[1], [0], [0], [1], [0, 0, 1, 1], [], []>} : vector<16x64xf32>, vector<64x64xf32>, vector<16x64xf32> -> vector<16x64xf32>
    %62 = vector.extract_strided_slice %61 {offsets = [0, 0], sizes = [16, 32], strides = [1, 1]} : vector<16x64xf32> to vector<16x32xf32>
    %63 = vector.extract_strided_slice %61 {offsets = [0, 32], sizes = [16, 32], strides = [1, 1]} : vector<16x64xf32> to vector<16x32xf32>
    %64 = vector.shape_cast %59 : vector<8x32xf32> to vector<8x4x8xf32>
    %65 = vector.shape_cast %62 : vector<16x32xf32> to vector<16x4x8xf32>
    %66 = vector.shape_cast %63 : vector<16x32xf32> to vector<16x4x8xf32>
    "tpu.trace_start"() <{level = 10 : i32, message = "ehd,nhd->hen"}> : () -> ()
    %cst_31 = arith.constant dense<0.000000e+00> : vector<4x8x16xf32>
    %67 = tpu.matmul %64, %65, %cst_31 {dimension_numbers = #tpu.dot_dimension_numbers<[2], [2], [0], [0], [0, 1, 0, 0, 1, 0], [1], [1]>} : vector<8x4x8xf32>, vector<16x4x8xf32>, vector<4x8x16xf32> -> vector<4x8x16xf32>
    "tpu.trace_stop"() : () -> ()
    %c0_32 = arith.constant 0 : index
    %c0_33 = arith.constant 0 : index
    %68 = vector.load %arg2[%c0_32, %c0_33] : memref<8x16xf32, #tpu.memory_space<vmem>>, vector<8x16xf32>
    %cst_34 = arith.constant 0.000000e+00 : f32
    %69 = vector.broadcast %cst_34 : f32 to vector<8x16xf32>
    %70 = arith.cmpf oeq, %68, %69 : vector<8x16xf32>
    %71 = vector.shape_cast %70 : vector<8x16xi1> to vector<1x8x16xi1>
    %cst_35 = arith.constant 0xFF800000 : f32
    %72 = vector.shape_cast %71 : vector<1x8x16xi1> to vector<1x8x16xi1>
    %73 = vector.broadcast %72 : vector<1x8x16xi1> to vector<4x8x16xi1>
    %74 = vector.broadcast %cst_35 : f32 to vector<4x8x16xf32>
    %75 = arith.select %73, %74, %67 : vector<4x8x16xi1>, vector<4x8x16xf32>
    %c0_36 = arith.constant 0 : index
    %c0_37 = arith.constant 0 : index
    %c0_38 = arith.constant 0 : index
    %76 = vector.load %arg14[%c0_36, %c0_37, %c0_38] : memref<4x8x16xf32, #tpu.memory_space<vmem>>, vector<4x8x16xf32>
    tpu.vector_store %arg14[%c0_36, %c0_37, %c0_38], %75 {strides = array<i32>} : memref<4x8x16xf32, #tpu.memory_space<vmem>>, vector<4x8x16xf32>,
    %cst_39 = arith.constant dense<0xFF800000> : vector<4x8xf32>
    %77 = vector.multi_reduction <maximumf>, %75, %cst_39 [2] : vector<4x8x16xf32> to vector<4x8xf32>
    %78 = vector.shape_cast %77 : vector<4x8xf32> to vector<4x8x1xf32>
    %79 = vector.broadcast %78 : vector<4x8x1xf32> to vector<4x8x16xf32>
    %80 = arith.subf %75, %79 : vector<4x8x16xf32>
    %81 = math.exp %80 : vector<4x8x16xf32>
    %cst_40 = arith.constant dense<0.000000e+00> : vector<4x8xf32>
    %82 = vector.multi_reduction <add>, %81, %cst_40 [2] : vector<4x8x16xf32> to vector<4x8xf32>
    %83 = vector.shape_cast %82 : vector<4x8xf32> to vector<4x8x1xf32>
    %84 = tpu.reciprocal %83 {approx = true} : vector<4x8x1xf32> -> vector<4x8x1xf32>
    %85 = vector.broadcast %84 : vector<4x8x1xf32> to vector<4x8x16xf32>
    %86 = arith.mulf %81, %85 : vector<4x8x16xf32>
    "tpu.trace_start"() <{level = 10 : i32, message = "hen,nhd->ehd"}> : () -> ()
    %cst_41 = arith.constant dense<0.000000e+00> : vector<4x8x8xf32>
    %87 = tpu.matmul %66, %86, %cst_41 {dimension_numbers = #tpu.dot_dimension_numbers<[0], [2], [2], [1], [0, 1, 0, 2, 1, 1], [1], [0]>} : vector<16x4x8xf32>, vector<4x8x16xf32>, vector<4x8x8xf32> -> vector<4x8x8xf32>
    %88 = tpu.transpose %87, [2, 0, 1] : vector<4x8x8xf32> -> vector<8x4x8xf32>
    "tpu.trace_stop"() : () -> ()
    %89 = vector.shape_cast %88 : vector<8x4x8xf32> to vector<8x32xf32>
    %90 = arith.negf %89 : vector<8x32xf32>
    %91 = math.exp %90 : vector<8x32xf32>
    %cst_42 = arith.constant 1.000000e+00 : f32
    %92 = vector.broadcast %cst_42 : f32 to vector<8x32xf32>
    %93 = arith.addf %92, %91 : vector<8x32xf32>
    %94 = arith.divf %92, %93 : vector<8x32xf32>
    %95 = arith.mulf %89, %94 : vector<8x32xf32>
    %96 = tpu.concatenate %24, %95 in 1 : vector<8x32xf32>, vector<8x32xf32> -> vector<8x64xf32>
    %c0_43 = arith.constant 0 : index
    %c0_44 = arith.constant 0 : index
    %97 = vector.load %arg11[%c0_43, %c0_44] : memref<64x32xf32, #tpu.memory_space<vmem>>, vector<64x32xf32>
    %cst_45 = arith.constant dense<0.000000e+00> : vector<8x32xf32>
    %98 = tpu.matmul %96, %97, %cst_45 {dimension_numbers = #tpu.dot_dimension_numbers<[1], [0], [0], [1], [0, 0, 1, 1], [], []>} : vector<8x64xf32>, vector<64x32xf32>, vector<8x32xf32> -> vector<8x32xf32>
    %c0_46 = arith.constant 0 : index
    %c0_47 = arith.constant 0 : index
    %99 = vector.load %arg12[%c0_46, %c0_47] : memref<1x32xf32, #tpu.memory_space<vmem>>, vector<1x32xf32>
    %100 = vector.broadcast %99 : vector<1x32xf32> to vector<8x32xf32>
    %101 = arith.addf %98, %100 : vector<8x32xf32>
    %c0_48 = arith.constant 0 : index
    %c0_49 = arith.constant 0 : index
    %102 = vector.load %arg13[%c0_48, %c0_49] : memref<8x32xf32, #tpu.memory_space<vmem>>, vector<8x32xf32>
    tpu.vector_store %arg13[%c0_48, %c0_49], %101 {strides = array<i32>} : memref<8x32xf32, #tpu.memory_space<vmem>>, vector<8x32xf32>,
    return
  }
}

</mosaic_0001>

<bundles_post_ra>
// kernel: tpu_custom_call.1
= control target key start
LH: loop header
LB: loop body
LE: loop exit
PB: predicated region body
PF: predicated region fallthrough
CT: control target
= control target key end

     0   :  { %20 = vsyncpa [#allocation3], 0  ;;  %vm51_vm0 = vcmask 261120   ;;  %s2432_s0 = inlined_call_operand.vmem [shape: f32[8,32], index: 0, kind: input, shape index: {}]   ;;  %s2433_s1 = inlined_call_operand.vmem [shape: f32[16,32], index: 1, kind: input, shape index: {}]   ;;  %s2434_s2 = inlined_call_operand.vmem [shape: f32[8,16], index: 2, kind: input, shape index: {}]   ;;  %s2435_s3 = inlined_call_operand.vmem [shape: f32[8,128], index: 3, kind: input, shape index: {}]   ;;  %s2436_s4 = inlined_call_operand.vmem [shape: f32[16,64], index: 4, kind: input, shape index: {}]   ;;  %s2437_s5 = inlined_call_operand.vmem [shape: f32[128,32], index: 5, kind: input, shape index: {}]   ;;  %s2438_s6 = inlined_call_operand.vmem [shape: f32[64,64], index: 6, kind: input, shape index: {}]   ;;  %s2439_s7 = inlined_call_operand.vmem [shape: f32[1,32], index: 7, kind: input, shape index: {}]   ;;  %s2440_s8 = inlined_call_operand.vmem [shape: f32[1,32], index: 8, kind: input, shape index: {}]   ;;  %s2441_s9 = inlined_call_operand.vmem [shape: f32[1,32], index: 9, kind: input, shape index: {}]   ;;  %s2442_s10 = inlined_call_operand.vmem [shape: f32[1,32], index: 10, kind: input, shape index: {}]   ;;  %s2443_s11 = inlined_call_operand.vmem [shape: f32[64,32], index: 11, kind: input, shape index: {}]   ;;  %s2444_s12 = inlined_call_operand.vmem [shape: f32[1,32], index: 12, kind: input, shape index: {}]   ;;  %s2445_s13 = inlined_call_operand.hbm [shape: f32[8,32], index: 13, kind: output, shape index: {0}]   ;;  %s2446_s14 = inlined_call_operand.hbm [shape: f32[4,8,16], index: 14, kind: output, shape index: {1}]  }
   0x1   :  { %v80_v0 = vld [vmem:[%s2433_s1] sm:$0xff]  ;;  %v81_v1 = vld [vmem:[%s2433_s1 + $0x8] sm:$0xff] }
   0x2   :  { %v48_v2 = vld [vmem:[%s2432_s0] sm:$0xff]  ;;  %v84_v3 = vsel %vm51_vm0, %v80_v0, 0.0 }
   0x3   :  { %v52_v4 = vsel %vm51_vm0, %v48_v2, 0.0 }
   0x4   :  { %21 = vsyncpa [#allocation5], 0  ;;  %85 = vadd.xlane.f32.xlu0 %v84_v3  ;;  %53 = vadd.xlane.f32.xlu1 %v52_v4  ;;  %v87_v5 = vsel %vm51_vm0, %v81_v1, 0.0  ;;  %v157_v21 = vld [vmem:[%s2437_s5] sm:$0xff]  ;;  %v158_v22 = vld [vmem:[%s2437_s5 + $0x8] sm:$0xff]  ;;  %v2032_v24 = vmov 0.0|0.0  }
   0x5   :  { %v159_v23 = vld [vmem:[%s2437_s5 + $0x10] sm:$0xff]  ;;  %1889 = vmatprep.subr.bf16.mxu0 %v2032_v24  ;;  %v1890_v25 = vpack.c.bf16 %v158_v22, %v157_v21  ;;  %v160_v26 = vld [vmem:[%s2437_s5 + $0x18] sm:$0xff]  ;;  %v244_v27 = vld [vmem:[%s2438_s6] sm:$0xff]  ;;  %s2033_s16 = smov 32   ;;  %vm2034_vm1 = vmmov 0   ;;  %vm137_vm2 = vcmask 523264  }
   0x6   :  { %v245_v28 = vld [vmem:[%s2438_s6 + $0x8] sm:$0xff]  ;;  %v246_v30 = vld [vmem:[%s2438_s6 + $0x10] sm:$0xff]  ;;  %v1893_v31 = vpack.c.bf16 %v160_v26, %v159_v23  ;;  %v161_v32 = vld [vmem:[%s2437_s5 + $0x20] sm:$0xff]  ;;  %vm139_vm3 = vcmask 785408   ;;  %s2039_s22 = smov 112   ;;  %vm488_vm4 = vcmask 64512  }
   0x7   :  { %v1913_v29 = vpack.c.bf16 %v245_v28, %v244_v27  ;;  %1891 = vmatpush3.bf16.msra.mxu0 %v1890_v25  ;;  %v247_v33 = vld [vmem:[%s2438_s6 + $0x18] sm:$0xff]  ;;  %v162_v34 = vld [vmem:[%s2437_s5 + $0x28] sm:$0xff]  ;;  %v248_v36 = vld [vmem:[%s2438_s6 + $0x20] sm:$0xff]  ;;  %vm785_vm6 = vcmask 130048   ;;  %s2044_s24 = smov 8   ;;  %s2045_s25 = smov 24  }
   0x8   :  { %88 = vadd.xlane.f32.xlu0 %v87_v5  ;;  %1892 = vmatprep.subr.bf16.mxu0 %v2032_v24  ;;  %v1917_v35 = vpack.c.bf16 %v247_v33, %v246_v30  ;;  %v249_v37 = vld [vmem:[%s2438_s6 + $0x28] sm:$0xff]  ;;  %v1896_v39 = vpack.c.bf16 %v162_v34, %v161_v32  ;;  %v163_v40 = vld [vmem:[%s2437_s5 + $0x30] sm:$0xff]  ;;  %v164_v41 = vld [vmem:[%s2437_s5 + $0x38] sm:$0xff]  ;;  %vm1568_vm7 = vcmask 195584  }
   0x9   :  { %1914 = vmatprep.subr.bf16.mxu1 %v1913_v29  ;;  %v1921_v38 = vpack.c.bf16 %v249_v37, %v248_v36  ;;  %v1899_v42 = vpack.c.bf16 %v164_v41, %v163_v40  ;;  %v165_v52 = vld [vmem:[%s2437_s5 + $0x40] sm:$0xff]  ;;  %v166_v53 = vld [vmem:[%s2437_s5 + $0x48] sm:$0xff]  ;;  %v250_v55 = vld [vmem:[%s2438_s6 + $0x30] sm:$0xff] }
   0xa   :  { %1916 = vmatpush3.bf16.msra.mxu1 %v1913_v29  ;;  %v1902_v54 = vpack.c.bf16 %v166_v53, %v165_v52  ;;  %v251_v56 = vld [vmem:[%s2438_s6 + $0x38] sm:$0xff]  ;;  %v167_v58 = vld [vmem:[%s2437_s5 + $0x50] sm:$0xff]  ;;  %v1703_v62 = vld [vmem:[%s2441_s9] ss:$0 sm:$0xff] }
   0xb   :  { %1918 = vmatprep.subr.bf16.mxu1 %v1917_v35  ;;  %1894 = vmatpush3.bf16.msra.mxu0 %v1893_v31  ;;  %v1925_v57 = vpack.c.bf16 %v251_v56, %v250_v55  ;;  %v168_v59 = vld [vmem:[%s2437_s5 + $0x58] sm:$0xff]  ;;  %v154_v25 = vld [vmem:[%s2436_s4 + $0x8] sm:$0xff]  ;;  %v141_v32 = vld [vmem:[%s2435_s3] sm:$0xff]  ;;  %s2040_s3 = smov 104  }
   0xc   :  { %1895 = vmatprep.subr.bf16.mxu0 %v2032_v24  ;;  %v1905_v60 = vpack.c.bf16 %v168_v59, %v167_v58  ;;  %v777_v55 = vld [vmem:[%s2434_s2] sm:$0xff]  ;;  %s2043_s2 = smov 16  }
   0xd   :  { %vm778_vm5 = vcmp.eq.f32.partialorder %v777_v55, 0.0 }
   0xe   :  { %1920 = vmatpush3.bf16.msra.mxu1 %v1917_v35 }
   0xf   :  { %1922 = vmatprep.subr.bf16.mxu1 %v1921_v38  ;;  %1897 = vmatpush3.bf16.msra.mxu0 %v1896_v39 }
  0x10   :  { %1898 = vmatprep.subr.bf16.mxu0 %v2032_v24 }
  0x12   :  { %1924 = vmatpush3.bf16.msra.mxu1 %v1921_v38 }
  0x13   :  { %1900 = vmatpush3.bf16.msra.mxu0 %v1899_v42  ;;  %1926 = vmatprep.subr.bf16.mxu1 %v1925_v57 }
  0x14   :  { %1901 = vmatprep.subr.bf16.mxu0 %v2032_v24 }
  0x16   :  { %1928 = vmatpush3.bf16.msra.mxu1 %v1925_v57 }
  0x17   :  { %1903 = vmatpush3.bf16.msra.mxu0 %v1902_v54 }
  0x18   :  { %1904 = vmatprep.subr.bf16.mxu0 %v2032_v24 }
  0x1b   :  { %1906 = vmatpush3.bf16.msra.mxu0 %v1905_v60 }
  0x1c   :  { %1907 = vmatprep.subr.bf16.mxu0 %v2032_v24 }
  0x91   :  { %v86_v6 = vpop.xlane.xlu0 %85  ;;  %v54_v7 = vpop.xlane.xlu1 %53 }
  0x92   :  { %v90_v8 = vmul.f32 0.03125, %v86_v6  ;;  %v56_v9 = vmul.f32 0.03125, %v54_v7 }
  0x94   :  { %v2136_v10 = vsub.f32 %v80_v0, %v90_v8  ;;  %v2138_v11 = vsub.f32 %v48_v2, %v56_v9  ;;  %v169_v0 = vld [vmem:[%s2437_s5 + $0x60] sm:$0xff] }
  0x95   :  { %v89_v12 = vpop.xlane.xlu0 %88  ;;  %v1704_v2 = vld [vmem:[%s2442_s10] ss:$0 sm:$0xff] }
  0x96   :  { %v91_v13 = vmul.f32 0.03125, %v89_v12  ;;  %v94_v14 = vmul.f32 %v2136_v10, %v2136_v10  ;;  %v58_v15 = vmul.f32 %v2138_v11, %v2138_v11  ;;  %v1701_v9 = vld [vmem:[%s2439_s7] ss:$0 sm:$0xff]  ;;  %v172_v12 = vld [vmem:[%s2437_s5 + $0x78] sm:$0xff]  ;;  %s2037_s7 = smov 64  }
  0x98   :  { %v2144_v16 = vsub.f32 %v81_v1, %v91_v13  ;;  %v96_v17 = vsel %vm51_vm0, %v94_v14, 0.0  ;;  %v59_v19 = vsel %vm51_vm0, %v58_v15, 0.0  ;;  %v170_v1 = vld [vmem:[%s2437_s5 + $0x68] sm:$0xff] }
  0x99   :  { %97 = vadd.xlane.f32.xlu1 %v96_v17  ;;  %v1908_v3 = vpack.c.bf16 %v170_v1, %v169_v0 }
  0x9a   :  { %v95_v18 = vmul.f32 %v2144_v16, %v2144_v16 }
  0x9b   :  { %1909 = vmatpush3.bf16.msra.mxu0 %v1908_v3 }
  0x9c   :  { %v99_v20 = vsel %vm51_vm0, %v95_v18, 0.0  ;;  %1910 = vmatprep.subr.bf16.mxu0 %v2032_v24  ;;  %v2035_v18 = vmov 0.0  }
  0x9d   :  { %100 = vadd.xlane.f32.xlu0 %v99_v20  ;;  %60 = vadd.xlane.f32.xlu1 %v59_v19  ;;  %v153_v20 = vld [vmem:[%s2436_s4] sm:$0xff]  ;;  %s2038_s4 = smov 120  }
  0x9e   :  { %1808 = vmatprep.mubr.msk.f32.mxu0 %vm2034_vm1, %v2035_v18  ;;  %1830 = vmatprep.subr.mxu1 %v2035_v18 }
 0x126   :  { %v98_v43 = vpop.xlane.xlu1 %97 }
 0x127   :  { %v102_v44 = vmul.f32 0.03125, %v98_v43 }
 0x129   :  { %v104_v45 = vadd.f32 1e-05, %v102_v44 }
 0x12a   :  { %v101_v46 = vpop.xlane.xlu0 %100  ;;  %v61_v47 = vpop.xlane.xlu1 %60 }
 0x12b   :  { %1958 = vrsqrt.f32 %v104_v45  ;;  %v103_v48 = vmul.f32 0.03125, %v101_v46  ;;  %v62_v49 = vmul.f32 0.03125, %v61_v47 }
 0x12d   :  { %v105_v50 = vadd.f32 1e-05, %v103_v48  ;;  %v63_v51 = vadd.f32 1e-05, %v62_v49 }
 0x12f   :  { %1960 = vrsqrt.f32 %v105_v50 }
 0x130   :  { %1962 = vrsqrt.f32 %v63_v51 }
 0x135   :  { %v1959_v61 = vpop.eup %1958 }
 0x136   :  { %v108_v63 = vmul.f32 %v1959_v61, %v2136_v10  ;;  %v171_v10 = vld [vmem:[%s2437_s5 + $0x70] sm:$0xff]  ;;  %s2036_s5 = smov 96  }
 0x137   :  { %v1911_v14 = vpack.c.bf16 %v172_v12, %v171_v10 }
 0x138   :  { %v116_v4 = vmul.f32 %v1703_v62, %v108_v63 }
 0x139   :  { %v1961_v5 = vpop.eup %1960  ;;  %1912 = vmatpush3.bf16.msra.mxu0 %v1911_v14 }
 0x13a   :  { %v1963_v6 = vpop.eup %1962  ;;  %v124_v7 = vadd.f32 %v1704_v2, %v116_v4  ;;  %v109_v8 = vmul.f32 %v1961_v5, %v2144_v16  ;;  %v1702_v16 = vld [vmem:[%s2440_s8] ss:$0 sm:$0xff]  ;;  %1929 = vmatprep.subr.bf16.mxu0 %v2032_v24 }
 0x13b   :  { %v65_v13 = vmul.f32 %v1963_v6, %v2138_v11 }
 0x13c   :  { %145 = vrot.lane.b32.xlu0 %v124_v7, %s2033_s16  ;;  %v117_v15 = vmul.f32 %v1703_v62, %v109_v8 }
 0x13d   :  { %v72_v17 = vmul.f32 %v1701_v9, %v65_v13 }
 0x13e   :  { %v125_v19 = vadd.f32 %v1704_v2, %v117_v15 }
 0x13f   :  { %v2251_v11 = vadd.f32 %v1702_v16, %v72_v17 }
 0x140   :  { %147 = vrot.lane.b32.xlu1 %v125_v19, %s2033_s16 }
 0x141   :  { %133 = vrot.lane.b32.xlu0 %v2251_v11, %s2036_s5 }
 0x144   :  { %127 = vrot.lane.b32.xlu1 %v2251_v11, %s2033_s16 }
 0x148   :  { %130 = vrot.lane.b32.xlu1 %v2251_v11, %s2037_s7 }
 0x1ae   :  { %v146_v21 = vpop.permute.xlu0 %145 }
 0x1af   :  { %v151_v22 = vsel %vm51_vm0, %v124_v7, %v146_v21 }
 0x1b0   :  { %v155_v23 = vmul.f32 %v153_v20, %v151_v22 }
 0x1b2   :  { %1827 = vmatprep.mubr.msk.f32.mxu1 %vm137_vm2, %v155_v23  ;;  %v148_v26 = vpop.permute.xlu1 %147 }
 0x1b3   :  { %v152_v27 = vsel %vm51_vm0, %v125_v19, %v148_v26  ;;  %v134_v33 = vpop.permute.xlu0 %133 }
 0x1b4   :  { %v156_v28 = vmul.f32 %v154_v25, %v152_v27 }
 0x1b6   :  { %1828 = vmatmul.mubr.msk.f32.vlgmr.msra.gmra.mrb[0].mxu1 %vm137_vm2, %v156_v28  ;;  %v128_v29 = vpop.permute.xlu1 %127 }
 0x1b7   :  { %1832 = vmatprep.mubr.msk.f32.mxu1 %vm2034_vm1, %v2035_v18  ;;  %v136_v30 = vsel %vm51_vm0, %v2251_v11, %v128_v29 }
 0x1ba   :  { %v131_v31 = vpop.permute.xlu1 %130 }
 0x1bb   :  { %v138_v34 = vsel %vm137_vm2, %v136_v30, %v131_v31 }
 0x1bc   :  { %v140_v35 = vsel %vm139_vm3, %v138_v34, %v134_v33 }
 0x1bd   :  { %v142_v36 = vmul.f32 %v141_v32, %v140_v35 }
 0x1bf   :  { %1809 = vmatmul.mubr.f32.vlgmr.msra.gmra.mrb[0].mxu0 %v142_v36 }
 0x1c0   :  { %1886 = vmatprep.mubr.msk.f32.mxu0 %vm2034_vm1, %v2035_v18 }
 0x289   :  { %v2279_v37 = vpop.f32.mrb[0].mxu1 }
 0x28a   :  { %344 = vrot.lane.b32.xlu0 %v2279_v37, %s2038_s4  ;;  %v2282_v38 = vpop.f32.mrb[1].mxu1 }
 0x28b   :  { %342 = vrot.lane.b32.xlu1 %v2282_v38, %s2038_s4 }
 0x28e   :  { %350 = vrot.lane.b32.xlu0 %v2279_v37, %s2039_s22 }
 0x28f   :  { %348 = vrot.lane.b32.xlu1 %v2282_v38, %s2039_s22 }
 0x292   :  { %356 = vrot.lane.b32.xlu0 %v2279_v37, %s2040_s3  ;;  %v239_v39 = vpop.f32.mrb[0].mxu0 }
 0x293   :  { %v243_v40 = vmul.f32 0.35355338, %v239_v39  ;;  %354 = vrot.lane.b32.xlu1 %v2282_v38, %s2040_s3  ;;  %v1810_v41 = vpop.f32.mrb[1].mxu0 }
 0x296   :  { %336 = vrot.lane.b32.xlu0 %v243_v40, %s2039_s22 }
 0x297   :  { %334 = vrot.lane.b32.xlu1 %v243_v40, %s2038_s4 }
 0x29b   :  { %338 = vrot.lane.b32.xlu1 %v243_v40, %s2040_s3 }
 0x2b4   :  { %360 = vxpose.xlu0.b32.start [1/2] (short) (narrow) %v2282_v38, 8 }
 0x2b8   :  { %361 = vxpose.xlu0.b32.end [2/2] (short) (narrow) %v2279_v37, 8 }
 0x2fc   :  { %v2294_v43 = vpop.permute.xlu0 %344 }
 0x2fd   :  { %v2291_v42 = vpop.permute.xlu1 %342 }
 0x2fe   :  { %392 = vxpose.xlu1.b32.start [1/2] (short) (narrow) %v2291_v42, 8 }
 0x300   :  { %v351_v45 = vpop.permute.xlu0 %350 }
 0x301   :  { %v2296_v44 = vpop.permute.xlu1 %348 }
 0x302   :  { %393 = vxpose.xlu1.b32.end [2/2] (short) (narrow) %v2294_v43, 8  ;;  %424 = vxpose.xlu0.b32.start [1/2] (short) (narrow) %v2296_v44, 8 }
 0x304   :  { %v357_v47 = vpop.permute.xlu0 %356 }
 0x305   :  { %v2300_v46 = vpop.permute.xlu1 %354 }
 0x306   :  { %425 = vxpose.xlu0.b32.end [2/2] (short) (narrow) %v351_v45, 8 }
 0x308   :  { %v337_v48 = vpop.permute.xlu0 %336 }
 0x309   :  { %v335_v50 = vpop.permute.xlu1 %334 }
 0x30a   :  { %456 = vxpose.xlu0.b32.start [1/2] (short) (narrow) %v2300_v46, 8 }
 0x30d   :  { %v339_v51 = vpop.permute.xlu1 %338 }
 0x30e   :  { %457 = vxpose.xlu0.b32.end [2/2] (short) (narrow) %v357_v47, 8 }
 0x334   :  { %v376_v49 = vpop.trf.xlu0 }
 0x335   :  { %1831 = vmatpush3.msra.mxu1 %v376_v49 }
 0x336   :  { %1833 = vmatmul.mubr.msk.f32.vlgmr.msra.gmra.mrb[2].mxu1 %vm488_vm4, %v243_v40  ;;  %1835 = vmatprep.subr.mxu1 %v2035_v18 }
 0x337   :  { %1837 = vmatprep.mubr.msk.f32.mxu1 %vm2034_vm1, %v2035_v18 }
 0x37e   :  { %v408_v52 = vpop.trf.xlu1 }
 0x37f   :  { %1836 = vmatpush3.msra.mxu1 %v408_v52 }
 0x380   :  { %1838 = vmatmul.mubr.msk.f32.vlgmr.msra.gmra.mrb[4].mxu1 %vm488_vm4, %v335_v50  ;;  %1840 = vmatprep.subr.mxu1 %v2035_v18 }
 0x381   :  { %1842 = vmatprep.mubr.msk.f32.mxu1 %vm2034_vm1, %v2035_v18 }
 0x382   :  { %v440_v53 = vpop.trf.xlu0 }
 0x383   :  { %1841 = vmatpush3.msra.mxu1 %v440_v53 }
 0x384   :  { %1843 = vmatmul.mubr.msk.f32.vlgmr.msra.gmra.mrb[6].mxu1 %vm488_vm4, %v337_v48  ;;  %1845 = vmatprep.subr.mxu1 %v2035_v18 }
 0x385   :  { %1847 = vmatprep.mubr.msk.f32.mxu1 %vm2034_vm1, %v2035_v18 }
 0x38a   :  { %v472_v54 = vpop.trf.xlu0 }
 0x38b   :  { %1846 = vmatpush3.msra.mxu1 %v472_v54 }
 0x38c   :  { %1848 = vmatmul.mubr.msk.f32.vlgmr.msra.gmra.mrb[8].mxu1 %vm488_vm4, %v339_v51  ;;  %1850 = vmatprep.subr.mxu1 %v2035_v18 }
 0x38d   :  { %1852 = vmatprep.mubr.msk.f32.mxu1 %vm2034_vm1, %v2035_v18 }
 0x409   :  { %v557_v56 = vpop.f32.mrb[2].mxu1 }
 0x40a   :  { %v781_v57 = vsel %vm778_vm5, -inf, %v557_v56  ;;  %v1834_v58 = vpop.f32.mrb[3].mxu1 }
 0x40b   :  { %786 = vst.msk [vmem:[#allocation4] sm:$0xff] %vm785_vm6, %v781_v57  ;;  %v790_v59 = vsel %vm785_vm6, %v781_v57, -inf }
 0x40c   :  { %791 = vmax.xlane.f32.xlu1 %v790_v59 }
 0x453   :  { %v629_v60 = vpop.f32.mrb[4].mxu1 }
 0x454   :  { %v782_v61 = vsel %vm778_vm5, -inf, %v629_v60  ;;  %v1839_v62 = vpop.f32.mrb[5].mxu1 }
 0x455   :  { %787 = vst.msk [vmem:[#allocation4 + $0x8] sm:$0xff] %vm785_vm6, %v782_v61  ;;  %v793_v63 = vsel %vm785_vm6, %v782_v61, -inf }
 0x456   :  { %794 = vmax.xlane.f32.xlu0 %v793_v63 }
 0x457   :  { %v701_v0 = vpop.f32.mrb[6].mxu1 }
 0x458   :  { %v783_v1 = vsel %vm778_vm5, -inf, %v701_v0  ;;  %v1844_v2 = vpop.f32.mrb[7].mxu1  ;;  %v2041_v0 = vmov 1983009808  }
 0x459   :  { %788 = vst.msk [vmem:[#allocation4 + $0x10] sm:$0xff] %vm785_vm6, %v783_v1  ;;  %v796_v3 = vsel %vm785_vm6, %v783_v1, -inf  ;;  %v1423_v2 = vlaneseq }
 0x45a   :  { %797 = vmax.xlane.f32.xlu1 %v796_v3  ;;  %v2042_v3 = vmov 1934713408  }
 0x45f   :  { %v773_v4 = vpop.f32.mrb[8].mxu1 }
 0x460   :  { %v784_v5 = vsel %vm778_vm5, -inf, %v773_v4  ;;  %v1849_v6 = vpop.f32.mrb[9].mxu1  ;;  %v1453_v4 = vunpack.c.l.s4 %v2042_v3 }
 0x461   :  { %789 = vst.msk [vmem:[#allocation4 + $0x18] sm:$0xff] %vm785_vm6, %v784_v5  ;;  %v799_v7 = vsel %vm785_vm6, %v784_v5, -inf  ;;  %v1424_v6 = vshrl.u32 %v1423_v2, 7 }
 0x462   :  { %800 = vmax.xlane.f32.xlu1 %v799_v7 }
 0x46c   :  { %834 = vrot.lane.b32.xlu0 %v2282_v38, %s2036_s5 }
 0x473   :  { %836 = vrot.lane.b32.xlu1 %v2279_v37, %s2036_s5 }
 0x477   :  { %838 = vrot.lane.b32.xlu1 %v2291_v42, %s2036_s5 }
 0x47b   :  { %840 = vrot.lane.b32.xlu1 %v2294_v43, %s2036_s5 }
 0x47f   :  { %842 = vrot.lane.b32.xlu1 %v2296_v44, %s2036_s5 }
 0x483   :  { %844 = vrot.lane.b32.xlu1 %v351_v45, %s2036_s5 }
 0x487   :  { %848 = vrot.lane.b32.xlu1 %v357_v47, %s2036_s5 }
 0x499   :  { %v792_v12 = vpop.xlane.xlu1 %791 }
 0x49a   :  { %v802_v25 = vsub.f32 %v781_v57, %v792_v12 }
 0x49c   :  { %v806_v26 = vmul.f32 1.442695, %v802_v25 }
 0x4e3   :  { %v795_v8 = vpop.xlane.xlu0 %794 }
 0x4e4   :  { %v803_v9 = vsub.f32 %v782_v61, %v795_v8  ;;  %v1454_v8 = vunpack.c.0.s8 %v1453_v4 }
 0x4e6   :  { %v808_v10 = vmul.f32 1.442695, %v803_v9 }
 0x4e7   :  { %v835_v13 = vpop.permute.xlu0 %834  ;;  %v798_v14 = vpop.xlane.xlu1 %797 }
 0x4e8   :  { %1964 = vpow2.f32 %v808_v10  ;;  %858 = vxpose.xlu0.b32.start [1/2] (short) (narrow) %v835_v13, 8  ;;  %v804_v31 = vsub.f32 %v783_v1, %v798_v14  ;;  %v1421_v1 = vunpack.c.l.s4 %v2041_v0 }
 0x4ea   :  { %v810_v32 = vmul.f32 1.442695, %v804_v31 }
 0x4ef   :  { %v801_v15 = vpop.xlane.xlu1 %800 }
 0x4f0   :  { %v805_v16 = vsub.f32 %v784_v5, %v801_v15  ;;  %v1422_v5 = vunpack.c.0.s8 %v1421_v1 }
 0x4f2   :  { %v1965_v17 = vpop.eup %1964  ;;  %v812_v19 = vmul.f32 1.442695, %v805_v16  ;;  %v1425_v9 = vsub.s32 %v1422_v5, %v1424_v6  ;;  %v1457_v16 = vsub.s32 %v1454_v8, %v1424_v6 }
 0x4f3   :  { %v837_v20 = vpop.permute.xlu1 %836  ;;  %v817_v21 = vsel %vm785_vm6, %v1965_v17, 0.0 }
 0x4f4   :  { %1966 = vpow2.f32 %v812_v19  ;;  %818 = vadd.xlane.f32.xlu1 %v817_v21  ;;  %859 = vxpose.xlu0.b32.end [2/2] (short) (narrow) %v837_v20, 8 }
 0x4f5   :  { %1968 = vpow2.f32 %v806_v26 }
 0x4f6   :  { %1970 = vpow2.f32 %v810_v32 }
 0x4f7   :  { %v839_v29 = vpop.permute.xlu1 %838 }
 0x4fb   :  { %v841_v30 = vpop.permute.xlu1 %840 }
 0x4fe   :  { %v1967_v22 = vpop.eup %1966 }
 0x4ff   :  { %v823_v23 = vsel %vm785_vm6, %v1967_v22, 0.0  ;;  %v1969_v27 = vpop.eup %1968  ;;  %v843_v35 = vpop.permute.xlu1 %842 }
 0x500   :  { %824 = vadd.xlane.f32.xlu1 %v823_v23  ;;  %v814_v28 = vsel %vm785_vm6, %v1969_v27, 0.0  ;;  %v1971_v33 = vpop.eup %1970 }
 0x501   :  { %v820_v34 = vsel %vm785_vm6, %v1971_v33, 0.0 }
 0x503   :  { %v845_v36 = vpop.permute.xlu1 %844 }
 0x507   :  { %v849_v38 = vpop.permute.xlu1 %848 }
 0x521   :  { %815 = vadd.xlane.f32.xlu0 %v814_v28 }
 0x533   :  { %890 = vxpose.xlu1.b32.start [1/2] (short) (narrow) %v839_v29, 8 }
 0x537   :  { %846 = vrot.lane.b32.xlu0 %v2300_v46, %s2036_s5  ;;  %891 = vxpose.xlu1.b32.end [2/2] (short) (narrow) %v841_v30, 8 }
 0x556   :  { %821 = vadd.xlane.f32.xlu0 %v820_v34 }
 0x570   :  { %v874_v37 = vpop.trf.xlu0 }
 0x581   :  { %v819_v39 = vpop.xlane.xlu1 %818 }
 0x583   :  { %922 = vxpose.xlu0.b32.start [1/2] (short) (narrow) %v843_v35, 8 }
 0x587   :  { %923 = vxpose.xlu0.b32.end [2/2] (short) (narrow) %v845_v36, 8 }
 0x58d   :  { %v825_v45 = vpop.xlane.xlu1 %824 }
 0x5ae   :  { %v816_v40 = vpop.xlane.xlu0 %815 }
 0x5af   :  { %1972 = vrcp.f32 %v816_v40 }
 0x5b0   :  { %1974 = vrcp.f32 %v819_v39 }
 0x5b2   :  { %v847_v41 = vpop.permute.xlu0 %846 }
 0x5b3   :  { %954 = vxpose.xlu0.b32.start [1/2] (short) (narrow) %v847_v41, 8  ;;  %v906_v47 = vpop.trf.xlu1 }
 0x5b7   :  { %955 = vxpose.xlu0.b32.end [2/2] (short) (narrow) %v849_v38, 8 }
 0x5b9   :  { %v1973_v42 = vpop.eup %1972 }
 0x5ba   :  { %v830_v43 = vmul.f32 %v1973_v42, %v1969_v27  ;;  %v1975_v44 = vpop.eup %1974 }
 0x5bb   :  { %v831_v46 = vmul.f32 %v1975_v44, %v1965_v17 }
 0x5bc   :  { %1851 = vmatpush3.xpose.msk.msra.mxu1 %vm785_vm6, %v830_v43 }
 0x5bd   :  { %1855 = vmatprep.subr.mxu1 %v2035_v18 }
 0x5bf   :  { %1853 = vmatmul.mubr.msk.f32.vlgmr.msra.gmra.mrb[10].mxu1 %vm785_vm6, %v874_v37 }
 0x5c0   :  { %1856 = vmatpush3.xpose.msk.msra.mxu1 %vm785_vm6, %v831_v46  ;;  %1857 = vmatprep.mubr.msk.f32.mxu1 %vm2034_vm1, %v2035_v18 }
 0x5c1   :  { %1860 = vmatprep.subr.mxu1 %v2035_v18 }
 0x5c3   :  { %1858 = vmatmul.mubr.msk.f32.vlgmr.msra.gmra.mrb[12].mxu1 %vm785_vm6, %v906_v47 }
 0x5c4   :  { %1862 = vmatprep.mubr.msk.f32.mxu1 %vm2034_vm1, %v2035_v18 }
 0x5e3   :  { %v822_v48 = vpop.xlane.xlu0 %821 }
 0x5e4   :  { %1976 = vrcp.f32 %v822_v48 }
 0x5e5   :  { %1978 = vrcp.f32 %v825_v45 }
 0x5ee   :  { %v1977_v49 = vpop.eup %1976 }
 0x5ef   :  { %v832_v50 = vmul.f32 %v1977_v49, %v1971_v33  ;;  %v1979_v51 = vpop.eup %1978 }
 0x5f0   :  { %v833_v52 = vmul.f32 %v1979_v51, %v1967_v22  ;;  %v1582_v51 = vld [vmem:[%s2443_s11] sm:$0xff] }
 0x5f1   :  { %1861 = vmatpush3.xpose.msk.msra.mxu1 %vm785_vm6, %v832_v50 }
 0x5f2   :  { %1865 = vmatprep.subr.mxu1 %v2035_v18 }
 0x603   :  { %v938_v53 = vpop.trf.xlu0 }
 0x604   :  { %1863 = vmatmul.mubr.msk.f32.vlgmr.msra.gmra.mrb[14].mxu1 %vm785_vm6, %v938_v53  ;;  %v1584_v53 = vld [vmem:[%s2443_s11 + $0x10] sm:$0xff] }
 0x605   :  { %1866 = vmatpush3.xpose.msk.msra.mxu1 %vm785_vm6, %v833_v52  ;;  %1867 = vmatprep.mubr.msk.f32.mxu1 %vm2034_vm1, %v2035_v18  ;;  %v1583_v52 = vld [vmem:[%s2443_s11 + $0x8] sm:$0xff] }
 0x633   :  { %v970_v54 = vpop.trf.xlu0 }
 0x634   :  { %1868 = vmatmul.mubr.msk.f32.vlgmr.msra.gmra.mrb[16].mxu1 %vm785_vm6, %v970_v54  ;;  %v1930_v54 = vpack.c.bf16 %v1583_v52, %v1582_v51 }
 0x636   :  { %1931 = vmatpush3.bf16.msra.mxu0 %v1930_v54 }
 0x637   :  { %1932 = vmatprep.subr.bf16.mxu0 %v2032_v24 }
 0x692   :  { %v1058_v55 = vpop.f32.mrb[10].mxu1 }
 0x693   :  { %v1854_v56 = vpop.f32.mrb[11].mxu1  ;;  %1290 = vxpose.xlu0.b32.start.end [1/1] (short) (narrow) %v1058_v55, 8  ;;  %v1585_v55 = vld [vmem:[%s2443_s11 + $0x18] sm:$0xff] }
 0x694   :  { %v1933_v56 = vpack.c.bf16 %v1585_v55, %v1584_v53 }
 0x696   :  { %v1134_v57 = vpop.f32.mrb[12].mxu1  ;;  %1934 = vmatpush3.bf16.msra.mxu0 %v1933_v56 }
 0x697   :  { %v1859_v58 = vpop.f32.mrb[13].mxu1  ;;  %1322 = vxpose.xlu0.b32.start.end [1/1] (short) (narrow) %v1134_v57, 8  ;;  %v1586_v57 = vld [vmem:[%s2443_s11 + $0x20] sm:$0xff]  ;;  %1935 = vmatprep.subr.bf16.mxu0 %v2032_v24 }
 0x698   :  { %v1587_v58 = vld [vmem:[%s2443_s11 + $0x28] sm:$0xff] }
 0x6d7   :  { %v1210_v59 = vpop.f32.mrb[14].mxu1 }
 0x6d8   :  { %1354 = vxpose.xlu1.b32.start.end [1/1] (short) (narrow) %v1210_v59, 8  ;;  %v1864_v60 = vpop.f32.mrb[15].mxu1  ;;  %v1936_v59 = vpack.c.bf16 %v1587_v58, %v1586_v57 }
 0x6d9   :  { %v1588_v60 = vld [vmem:[%s2443_s11 + $0x30] sm:$0xff] }
 0x6da   :  { %1937 = vmatpush3.bf16.msra.mxu0 %v1936_v59 }
 0x6db   :  { %1938 = vmatprep.subr.bf16.mxu0 %v2032_v24 }
 0x707   :  { %v1286_v61 = vpop.f32.mrb[16].mxu1 }
 0x708   :  { %1386 = vxpose.xlu0.b32.start.end [1/1] (short) (narrow) %v1286_v61, 8  ;;  %v1869_v62 = vpop.f32.mrb[17].mxu1  ;;  %v1589_v61 = vld [vmem:[%s2443_s11 + $0x38] sm:$0xff]  ;;  %s2046_s11 = smov [#allocation4]  }
 0x709   :  { %v1939_v62 = vpack.c.bf16 %v1589_v61, %v1588_v60  ;;  %s1686_s20 = sshll.u32 %s2046_s11, 4  ;;  %s1687_s20 = int_to_ptr.vmem [resolvable:$true] %s1686_s20 }
 0x70a   :  { %s1984_s21 = scalar_lea.vmem %s1687_s20, 512  ;;  %p1989_p1 = scmp.lt.s32.totalorder %s1687_s20, %s1687_s20 }
 0x70b   :  { %1940 = vmatpush3.bf16.msra.mxu0 %v1939_v62  ;;  %p1985_p0 = scmp.ne.s32.totalorder %s1687_s20, %s1984_s21  ;;  %p1990_p2 = scmp.lt.s32.totalorder %s1984_s21, %s1984_s21 }
 0x70d   :  { %p1991_p3 = por %p1990_p2, %p1989_p1 }
 0x70f   :  { %p1992_p4 = pnand %p1991_p3, %p1985_p0 }
 0x713   :  { %v1306_v63 = vpop.trf.xlu0 }
 0x717   :  { %v1338_v18 = vpop.trf.xlu0 }
 0x758   :  { %v1370_v7 = vpop.trf.xlu1 }
 0x759   :  { %v1418_v10 = vcombine.low %v1306_v63, %v1370_v7  ;;  %v1419_v12 = vcombine.high %v1306_v63, %v1370_v7 }
 0x75b   :  { %v1426_v17 = vrot.slane %v1418_v10, %v1425_v9  ;;  %v1433_v19 = vrot.slane %v1419_v12, %v1425_v9 }
 0x788   :  { %v1402_v13 = vpop.trf.xlu0 }
 0x789   :  { %v1434_v14 = vcombine.low %v1338_v18, %v1402_v13  ;;  %v1435_v15 = vcombine.high %v1338_v18, %v1402_v13 }
 0x78b   :  { %v1442_v20 = vrot.slane %v1434_v14, %v1425_v9  ;;  %v1449_v21 = vrot.slane %v1435_v15, %v1425_v9 }
 0x78d   :  { %v1450_v22 = vcombine.low %v1426_v17, %v1442_v20  ;;  %v1451_v23 = vcombine.high %v1426_v17, %v1442_v20  ;;  %v1466_v25 = vcombine.low %v1433_v19, %v1449_v21  ;;  %v1467_v26 = vcombine.high %v1433_v19, %v1449_v21 }
 0x78f   :  { %v1458_v27 = vrot.slane %v1450_v22, %v1457_v16  ;;  %v1465_v28 = vrot.slane %v1451_v23, %v1457_v16  ;;  %v1474_v29 = vrot.slane %v1466_v25, %v1457_v16  ;;  %v1481_v30 = vrot.slane %v1467_v26, %v1457_v16 }
 0x791   :  { %v1486_v31 = vcombine.low %v1458_v27, %v1465_v28  ;;  %v1719_v32 = vcombine.high %v1458_v27, %v1465_v28  ;;  %v1502_v33 = vcombine.low %v1474_v29, %v1481_v30  ;;  %v1720_v34 = vcombine.high %v1474_v29, %v1481_v30 }
 0x793   :  { %v1493_v35 = vrot.slane %v1486_v31, %v1425_v9  ;;  %v1501_v36 = vrot.slane %v1719_v32, %v1425_v9  ;;  %v1509_v37 = vrot.slane %v1502_v33, %v1425_v9  ;;  %v1517_v38 = vrot.slane %v1720_v34, %v1425_v9 }
 0x795   :  { %v1519_v39 = vcombine.high %v1493_v35, %v1501_v36  ;;  %v1535_v40 = vcombine.high %v1509_v37, %v1517_v38  ;;  %v1518_v41 = vcombine.low %v1493_v35, %v1501_v36  ;;  %v1534_v42 = vcombine.low %v1509_v37, %v1517_v38 }
 0x797   :  { %v1533_v43 = vrot.slane %v1519_v39, %v1457_v16  ;;  %v1549_v44 = vrot.slane %v1535_v40, %v1457_v16  ;;  %v1526_v45 = vrot.slane %v1518_v41, %v1457_v16  ;;  %v1542_v46 = vrot.slane %v1534_v42, %v1457_v16 }
 0x799   :  { %v1552_v47 = vcombine.low %v1533_v43, %v1549_v44  ;;  %v1551_v48 = vcombine.high %v1526_v45, %v1542_v46  ;;  %v1550_v49 = vcombine.low %v1526_v45, %v1542_v46  ;;  %v1553_v50 = vcombine.high %v1533_v43, %v1549_v44 }
 0x79b   :  { %1559 = vrot.lane.b32.xlu0 %v1552_v47, %s2043_s2  ;;  %1555 = vrot.lane.b32.xlu1 %v1551_v48, %s2044_s24 }
 0x79f   :  { %1563 = vrot.lane.b32.xlu1 %v1553_v50, %s2045_s25 }
 0x80d   :  { %v1556_v63 = vpop.permute.xlu1 %1555  ;;  %v1560_v0 = vpop.permute.xlu0 %1559 }
 0x80e   :  { %v1566_v1 = vsel %vm488_vm4, %v1550_v49, %v1556_v63 }
 0x80f   :  { %v1567_v18 = vsel %vm785_vm6, %v1566_v1, %v1560_v0 }
 0x811   :  { %v1564_v2 = vpop.permute.xlu1 %1563 }
 0x812   :  { %v1569_v3 = vsel %vm1568_vm7, %v1567_v18, %v1564_v2 }
 0x813   :  { %v1721_v4 = vmul.f32 -1.442695, %v1569_v3 }
 0x815   :  { %1980 = vpow2.f32 %v1721_v4 }
 0x81f   :  { %v1981_v5 = vpop.eup %1980 }
 0x820   :  { %v1573_v6 = vadd.f32 1.0, %v1981_v5 }
 0x822   :  { %1982 = vrcp.f32 %v1573_v6 }
 0x82c   :  { %v1983_v7 = vpop.eup %1982 }
 0x82d   :  { %v1576_v8 = vmul.f32 %v1983_v7, %v1569_v3 }
 0x82f   :  { %1578 = vrot.lane.b32.xlu1 %v1576_v8, %s2033_s16 }
 0x8a1   :  { %v1579_v24 = vpop.permute.xlu1 %1578 }
 0x8a2   :  { %v1581_v9 = vsel %vm51_vm0, %v2251_v11, %v1579_v24 }
 0x8a3   :  { %1887 = vmatmul.mubr.msk.f32.vlgmr.msra.gmra.mrb[2].mxu0 %vm137_vm2, %v1581_v9 }
 0x8a4   :  { %1995 = shalt.err (!%p1992_p4)
}
 0x8a5   :  { %s1996_s16 = scalar_lea.hbm %s2446_s14, 512 }
 0x8a6   :  { %p1997_p5 = scmp.ne.s32.totalorder %s2446_s14, %s1996_s16  ;;  %p2000_p6 = scmp.lt.u32.totalorder %s1996_s16, %s2446_s14 }
 0x8a8   :  { %p2002_p7 = pnand %p2000_p6, %p1997_p5 }
 0x8aa   :  { %2005 = shalt.err (!%p2002_p7)
}
 0x8ab   :  { %s2047_s25 = smov 128   ;;  %v1722_v11 = vld [vmem:[%s2444_s12] ss:$0 sm:$0xff]  ;;  %s2048_s29 = smov [#allocation2]  }
 0x8ac   :  { %1692 = dma.vmem_to_hbm [thread:$0]  %s1687_s20, 512, %s2446_s14, [#allocation5], %s2047_s25, %s2047_s25, %s2044_s24  }
 0x8ad   :  { %s1677_s30 = sshll.u32 %s2048_s29, 4  ;;  %s1678_s30 = int_to_ptr.vmem [resolvable:$true] %s1677_s30 }
 0x8ae   :  { %s2006_s15 = scalar_lea.vmem %s1678_s30, 128  ;;  %p2011_p9 = scmp.lt.s32.totalorder %s1678_s30, %s1678_s30 }
 0x8af   :  { %p2007_p8 = scmp.ne.s32.totalorder %s1678_s30, %s2006_s15  ;;  %p2012_p10 = scmp.lt.s32.totalorder %s2006_s15, %s2006_s15 }
 0x8b1   :  { %p2013_p11 = por %p2012_p10, %p2011_p9 }
 0x8b3   :  { %p2014_p12 = pnand %p2013_p11, %p2007_p8 }
 0x976   :  { %v1666_v10 = vpop.f32.mrb[2].mxu0 }
 0x977   :  { %v1667_v12 = vadd.f32 %v1722_v11, %v1666_v10  ;;  %v1888_v13 = vpop.f32.mrb[3].mxu0 }
 0x979   :  { %1670 = vst.msk [vmem:[#allocation2] sm:$0xff] %vm51_vm0, %v1667_v12 }
 0x97a   :  { %2017 = shalt.err (!%p2014_p12)
}
 0x97b   :  { %s2018_s10 = scalar_lea.hbm %s2445_s13, 128 }
 0x97c   :  { %p2019_p13 = scmp.ne.s32.totalorder %s2445_s13, %s2018_s10  ;;  %p2022_p0 = scmp.lt.u32.totalorder %s2018_s10, %s2445_s13 }
 0x97e   :  { %p2024_p1 = pnand %p2022_p0, %p2019_p13 }
 0x980   :  { %2027 = shalt.err (!%p2024_p1)
}
 0x981   :  { %1680 = dma.vmem_to_hbm [thread:$0]  %s1678_s30, 128, %s2445_s13, [#allocation3]  }
 0x982   :  { %2028 = dma.done.wait [#allocation3], 128  }
 0x983   :  { %2029 = vsyncadd [#allocation3], 4294967168 }
 0x984   :  { %2030 = dma.done.wait [#allocation5], 512  }
 0x985   :  { %2031 = vsyncadd [#allocation5], 4294966784 }
 0x986   :  { %1699 = vsyncpa [#allocation3], 1 }
 0x987   :  { %1700 = vsyncpa [#allocation5], 1 }

</bundles_post_ra>
